<compile_context>
chip_gen: v5e
topology: v5e:2x2
jax: 0.10.0
libtpu: 0.0.40
codegen_flags: <defaults>
</compile_context>

<pallas_src>
import jax
import jax.numpy as jnp
from jax.experimental import pallas as pl
from jax.experimental.pallas import tpu as pltpu


# ------------------------------- config -------------------------------------
OBS_DIM = 53          # 3 own + 2 defenders + 2 attackers + 3 target + 3 boundary + 40 obstacles
MAX_NEIGHBORS = 1
MAX_ATTACKERS = 1
D_SELF = 64
D_TEAM = 32
D_ENV = 64
ENV_CHANNELS = 16
CONV_K = 3

OWN_DIM = 3
ND_DIM = 2 * MAX_NEIGHBORS
KA_DIM = 2 * MAX_ATTACKERS
TGT_DIM = 3
BND_DIM = 3
OBST_DIM = OBS_DIM - (OWN_DIM + ND_DIM + KA_DIM + TGT_DIM + BND_DIM)   # 40
SELF_DIM = OWN_DIM + TGT_DIM + BND_DIM + KA_DIM                        # 11
TEAM_DIM = ND_DIM + KA_DIM                                             # 4
ST_DIM = D_SELF + D_TEAM                                               # 96
OUT_DIM = D_SELF + D_TEAM + D_ENV                                      # 160
CONV_FLAT = ENV_CHANNELS * OBST_DIM                                    # 640
AUG_DIM = OBS_DIM + 1                                                  # 54 (bias column)
BIG_OUT = CONV_FLAT + ST_DIM                                           # 736

MAX_BLK_B = 2048   # working set ~20 MiB at 2048 -> safe on v5e/v6e/v7x w/ 48 MiB limit


def _round_up(x, m):
    return ((x + m - 1) // m) * m


def _leaky(x, slope=0.01):
    # max-form: 2 VPU ops (mul + max) instead of cmp + mul + select.
    return jnp.maximum(x, x * slope)


# ------------------------------ Pallas kernel -------------------------------
def obs_encoder_kernel(obs_ref, w_big_ref, w_env_ref, b_env_ref, out_ref, xa_ref):
    blk = obs_ref.shape[0]

    # Bias-folded input: [obs || 1] in bf16.  The extra K column is free on the
    # MXU (K=53 is already zero-padded to 128/256); biases live in row 53 of w_big.
    xa_ref[:, 0:OBS_DIM] = obs_ref[...].astype(jnp.bfloat16)
    xa_ref[:, OBS_DIM:AUG_DIM] = jnp.ones((blk, 1), jnp.bfloat16)

    # One fused first-stage matmul: columns [0:640] = conv pre-activations,
    # columns [640:736] = self||team pre-activations (bias already included).
    big = jnp.dot(xa_ref[...], w_big_ref[...],
                  preferred_element_type=jnp.float32)          # (blk, 736) f32

    # --- self + teammate branch (96 cols, cheap): leaky in f32, store cols 0:96.
    st = _leaky(big[:, CONV_FLAT:])
    out_ref[:, 0:ST_DIM] = st.astype(out_ref.dtype)

    # --- env branch: leaky in bf16 (cast is required for the MXU anyway;
    #     packed VPU on v6e/v7x), then one K=640 matmul with internal MXU
    #     accumulation, env-FC bias + leaky in f32 (only 64 wide).
    c = _leaky(big[:, :CONV_FLAT].astype(jnp.bfloat16))        # (blk, 640) bf16
    env = jnp.dot(c, w_env_ref[...],
                  preferred_element_type=jnp.float32) + b_env_ref[...]
    env = _leaky(env)
    out_ref[:, ST_DIM:OUT_DIM] = env.astype(out_ref.dtype)


# ------------------------------ parameter glue -------------------------------
def build_conv_matrix(w_conv, b_conv, length):
    """Conv1d(1->C, K, padding=K//2) as a (L, C*L) matmul (channel-major flatten)."""
    C, _, K = w_conv.shape
    pad = K // 2
    j = jnp.arange(length)[:, None]         # input position
    l = jnp.arange(length)[None, :]         # output position
    k = j - l + pad                         # tap index, (L, L)
    valid = (k >= 0) & (k < K)
    k_c = jnp.clip(k, 0, K - 1)
    w2 = w_conv[:, 0, :]                    # (C, K)
    A = jnp.where(valid[None, :, :], w2[:, k_c], 0.0)          # (C, L_in, L_out)
    A = jnp.transpose(A, (1, 0, 2)).reshape(length, C * length)
    b_flat = jnp.repeat(b_conv, length)     # flat index c*L+l -> b[c]
    return A, b_flat


def _selection_matrices():
    """Linear maps obs -> self_obs (11) and obs -> team_obs (4, with ka-nd folded)."""
    S_self = jnp.zeros((OBS_DIM, SELF_DIM), jnp.float32)
    src_self = jnp.array([0, 1, 2, 7, 8, 9, 10, 11, 12, 5, 6])   # own|tgt|bnd|ka
    S_self = S_self.at[src_self, jnp.arange(SELF_DIM)].set(1.0)

    S_team = jnp.zeros((OBS_DIM, TEAM_DIM), jnp.float32)
    S_team = S_team.at[jnp.array([3, 4]), jnp.array([0, 1])].set(1.0)   # nd
    S_team = S_team.at[jnp.array([5, 6]), jnp.array([2, 3])].set(1.0)   # ka
    S_team = S_team.at[jnp.array([3, 4]), jnp.array([2, 3])].add(-1.0)  # -nd
    return S_self, S_team


def prepare_params(params):
    """One-time prep: fold slicing+biases into a single (54, 736) first-stage weight."""
    S_self, S_team = _selection_matrices()
    w_st = jnp.concatenate([S_self @ params["w_self"],
                            S_team @ params["w_team"]], axis=1)          # (53, 96)
    b_st = jnp.concatenate([params["b_self"], params["b_team"]])         # (96,)

    A_conv, b_cflat = build_conv_matrix(params["w_conv"], params["b_conv"],
                                        OBST_DIM)                        # (40, 640)
    A_ext = jnp.zeros((OBS_DIM, CONV_FLAT), jnp.float32)
    A_ext = A_ext.at[OBS_DIM - OBST_DIM:, :].set(A_conv)                 # rows 13:53

    # Fused first-stage weight: conv columns FIRST (lane-aligned 0:640),
    # self||team at 640:736; row 53 carries the folded biases.
    w_big = jnp.zeros((AUG_DIM, BIG_OUT), jnp.float32)
    w_big = w_big.at[:OBS_DIM, :CONV_FLAT].set(A_ext)
    w_big = w_big.at[:OBS_DIM, CONV_FLAT:].set(w_st)
    w_big = w_big.at[OBS_DIM, :CONV_FLAT].set(b_cflat)
    w_big = w_big.at[OBS_DIM, CONV_FLAT:].set(b_st)

    return {
        "w_big": w_big.astype(jnp.bfloat16),                  # (54, 736)
        "w_env": params["w_env"].astype(jnp.bfloat16),        # (640, 64)
        "b_env": params["b_env"][None, :].astype(jnp.float32) # (1, 64)
    }


def init_params(key):
    ks = jax.random.split(key, 8)
    s = 0.1
    return {
        "w_self": s * jax.random.normal(ks[0], (SELF_DIM, D_SELF), jnp.float32),
        "b_self": s * jax.random.normal(ks[1], (D_SELF,), jnp.float32),
        "w_team": s * jax.random.normal(ks[2], (TEAM_DIM, D_TEAM), jnp.float32),
        "b_team": s * jax.random.normal(ks[3], (D_TEAM,), jnp.float32),
        "w_conv": s * jax.random.normal(ks[4], (ENV_CHANNELS, 1, CONV_K), jnp.float32),
        "b_conv": s * jax.random.normal(ks[5], (ENV_CHANNELS,), jnp.float32),
        "w_env": s * jax.random.normal(ks[6], (CONV_FLAT, D_ENV), jnp.float32),
        "b_env": s * jax.random.normal(ks[7], (D_ENV,), jnp.float32),
    }


# ------------------------------ wrapper --------------------------------------
def observation_encoder(obs, prepped, *, max_block_b=MAX_BLK_B):
    """obs: (B, OBS_DIM) float32 -> (B, OUT_DIM) float32."""
    B = obs.shape[0]
    blk_b = min(max_block_b, _round_up(B, 8))
    # Force >=2 grid steps when the batch allows it so ("parallel",) can shard
    # across v7x's two TensorCores (no-op on v5e/v6e).
    if blk_b >= B and B >= 16:
        blk_b = max(8, _round_up(pl.cdiv(B, 2), 8))
    grid = (pl.cdiv(B, blk_b),)

    res = lambda i: (0, 0)   # weights stay resident across the batch grid

    return pl.pallas_call(
        obs_encoder_kernel,
        out_shape=jax.ShapeDtypeStruct((B, OUT_DIM), jnp.float32),
        grid=grid,
        in_specs=[
            pl.BlockSpec((blk_b, OBS_DIM), lambda i: (i, 0)),
            pl.BlockSpec(prepped["w_big"].shape, res),
            pl.BlockSpec(prepped["w_env"].shape, res),
            pl.BlockSpec(prepped["b_env"].shape, res),
        ],
        out_specs=pl.BlockSpec((blk_b, OUT_DIM), lambda i: (i, 0)),
        scratch_shapes=[pltpu.VMEM((blk_b, AUG_DIM), jnp.bfloat16)],
        compiler_params=pltpu.CompilerParams(
            dimension_semantics=("parallel",),
            vmem_limit_bytes=48 * 1024 * 1024),
    )(obs, prepped["w_big"], prepped["w_env"], prepped["b_env"])


# ------------------------------ pure-JAX reference ---------------------------
def reference_forward(obs, params):
    def leaky(x):
        return jnp.where(x > 0, x, 0.01 * x)
    own = obs[:, 0:3]
    nd = obs[:, 3:3 + ND_DIM]
    ka = obs[:, 5:5 + KA_DIM]
    tgt = obs[:, 7:10]
    bnd = obs[:, 10:13]
    obst = obs[:, 13:]
    self_obs = jnp.concatenate([own, tgt, bnd, ka], axis=-1)
    team_obs = jnp.concatenate([nd, ka - nd], axis=-1)
    self_emb = leaky(self_obs @ params["w_self"] + params["b_self"])
    team_emb = leaky(team_obs @ params["w_team"] + params["b_team"])
    C, _, K = params["w_conv"].shape
    pad = K // 2
    L = obst.shape[1]
    xp = jnp.pad(obst, ((0, 0), (pad, pad)))
    conv = jnp.stack(
        [sum(params["w_conv"][c, 0, k] * xp[:, k:k + L] for k in range(K))
         + params["b_conv"][c] for c in range(C)],
        axis=1)                                         # (B, C, L)
    conv = leaky(conv)
    flat = conv.reshape(obst.shape[0], -1)              # channel-major, like .view
    env_emb = leaky(flat @ params["w_env"] + params["b_env"])
    return jnp.concatenate([self_emb, team_emb, env_emb], axis=-1)


# ------------------------------ main ------------------------------------------
if __name__ == "__main__":
    key = jax.random.PRNGKey(0)
    k_obs, k_par, k_obs2 = jax.random.split(key, 3)
    params = init_params(k_par)
    prepped = prepare_params(params)          # one-time parameter prep (hoisted)

    # small exact-fit batch (single grid step)
    B = 8
    obs = jax.random.normal(k_obs, (B, OBS_DIM), jnp.float32)
    out = jax.block_until_ready(observation_encoder(obs, prepped))
    ref = reference_forward(obs, params)
    assert out.shape == (B, OUT_DIM), out.shape
    err = float(jnp.max(jnp.abs(out - ref)))
    assert jnp.allclose(out, ref, rtol=3e-2, atol=3e-2), err

    # small batch exercising multi-step grid + ragged tail
    B2 = 24
    obs2 = jax.random.normal(k_obs2, (B2, OBS_DIM), jnp.float32)
    out2 = jax.block_until_ready(observation_encoder(obs2, prepped))
    ref2 = reference_forward(obs2, params)
    err2 = float(jnp.max(jnp.abs(out2 - ref2)))
    assert out2.shape == (B2, OUT_DIM), out2.shape
    assert jnp.allclose(out2, ref2, rtol=3e-2, atol=3e-2), err2

    print("KERNEL_OK")
</pallas_src>

<mosaic_0001>
module attributes {stable_mosaic.version = 11 : i64} {
  func.func @obs_encoder_kernel(%arg0: i32, %arg1: memref<8x53xf32, #tpu.memory_space<vmem>>, %arg2: memref<54x736xbf16, #tpu.memory_space<vmem>>, %arg3: memref<640x64xbf16, #tpu.memory_space<vmem>>, %arg4: memref<1x64xf32, #tpu.memory_space<vmem>>, %arg5: memref<8x160xf32, #tpu.memory_space<vmem>>, %arg6: memref<8x54xbf16, #tpu.memory_space<vmem>>) attributes {dimension_semantics = [#tpu.dimension_semantics<parallel>], iteration_bounds = array<i64: 1>, scalar_prefetch = 0 : i64, scratch_operands = 1 : i64, tpu.core_type = #tpu.core_type<tc>, window_params = [{transform_indices = @transform_0, window_bounds = array<i64: 8, 53>}, {pipeline_mode = #tpu.pipeline_mode<synchronous>, transform_indices = @transform_1, window_bounds = array<i64: 54, 736>}, {pipeline_mode = #tpu.pipeline_mode<synchronous>, transform_indices = @transform_2, window_bounds = array<i64: 640, 64>}, {pipeline_mode = #tpu.pipeline_mode<synchronous>, transform_indices = @transform_3, window_bounds = array<i64: 1, 64>}, {transform_indices = @transform_4, window_bounds = array<i64: 8, 160>}]} {
    %c0 = arith.constant 0 : index
    %c0_0 = arith.constant 0 : index
    %0 = vector.load %arg1[%c0, %c0_0] : memref<8x53xf32, #tpu.memory_space<vmem>>, vector<8x53xf32>
    %1 = arith.truncf %0 : vector<8x53xf32> to vector<8x53xbf16>
    %c0_1 = arith.constant 0 : index
    %c0_2 = arith.constant 0 : index
    %2 = vector.load %arg6[%c0_1, %c0_2] : memref<8x54xbf16, #tpu.memory_space<vmem>>, vector<8x53xbf16>
    tpu.vector_store %arg6[%c0_1, %c0_2], %1 {strides = array<i32>} : memref<8x54xbf16, #tpu.memory_space<vmem>>, vector<8x53xbf16>,
    %cst = arith.constant 1.000000e+00 : bf16
    %3 = vector.broadcast %cst : bf16 to vector<8x1xbf16>
    %c0_3 = arith.constant 0 : index
    %c53 = arith.constant 53 : index
    %4 = vector.load %arg6[%c0_3, %c53] : memref<8x54xbf16, #tpu.memory_space<vmem>>, vector<8x1xbf16>
    tpu.vector_store %arg6[%c0_3, %c53], %3 {strides = array<i32>} : memref<8x54xbf16, #tpu.memory_space<vmem>>, vector<8x1xbf16>,
    %c0_4 = arith.constant 0 : index
    %c0_5 = arith.constant 0 : index
    %5 = vector.load %arg6[%c0_4, %c0_5] : memref<8x54xbf16, #tpu.memory_space<vmem>>, vector<8x54xbf16>
    %c0_6 = arith.constant 0 : index
    %c0_7 = arith.constant 0 : index
    %6 = vector.load %arg2[%c0_6, %c0_7] : memref<54x736xbf16, #tpu.memory_space<vmem>>, vector<54x736xbf16>
    %cst_8 = arith.constant dense<0.000000e+00> : vector<8x736xf32>
    %7 = tpu.matmul %5, %6, %cst_8 {dimension_numbers = #tpu.dot_dimension_numbers<[1], [0], [0], [1], [0, 0, 1, 1], [], []>} : vector<8x54xbf16>, vector<54x736xbf16>, vector<8x736xf32> -> vector<8x736xf32>
    %8 = vector.extract_strided_slice %7 {offsets = [0, 640], sizes = [8, 96], strides = [1, 1]} : vector<8x736xf32> to vector<8x96xf32>
    %cst_9 = arith.constant 0.00999999977 : f32
    %9 = vector.broadcast %cst_9 : f32 to vector<8x96xf32>
    %10 = arith.mulf %8, %9 : vector<8x96xf32>
    %11 = arith.maximumf %8, %10 : vector<8x96xf32>
    %c0_10 = arith.constant 0 : index
    %c0_11 = arith.constant 0 : index
    %12 = vector.load %arg5[%c0_10, %c0_11] : memref<8x160xf32, #tpu.memory_space<vmem>>, vector<8x96xf32>
    tpu.vector_store %arg5[%c0_10, %c0_11], %11 {strides = array<i32>} : memref<8x160xf32, #tpu.memory_space<vmem>>, vector<8x96xf32>,
    %13 = vector.extract_strided_slice %7 {offsets = [0, 0], sizes = [8, 640], strides = [1, 1]} : vector<8x736xf32> to vector<8x640xf32>
    %14 = arith.truncf %13 : vector<8x640xf32> to vector<8x640xbf16>
    %cst_12 = arith.constant 1.000980e-02 : bf16
    %15 = vector.broadcast %cst_12 : bf16 to vector<8x640xbf16>
    %16 = arith.mulf %14, %15 : vector<8x640xbf16>
    %17 = arith.maximumf %14, %16 : vector<8x640xbf16>
    %c0_13 = arith.constant 0 : index
    %c0_14 = arith.constant 0 : index
    %18 = vector.load %arg3[%c0_13, %c0_14] : memref<640x64xbf16, #tpu.memory_space<vmem>>, vector<640x64xbf16>
    %cst_15 = arith.constant dense<0.000000e+00> : vector<8x64xf32>
    %19 = tpu.matmul %17, %18, %cst_15 {dimension_numbers = #tpu.dot_dimension_numbers<[1], [0], [0], [1], [0, 0, 1, 1], [], []>} : vector<8x640xbf16>, vector<640x64xbf16>, vector<8x64xf32> -> vector<8x64xf32>
    %c0_16 = arith.constant 0 : index
    %c0_17 = arith.constant 0 : index
    %20 = vector.load %arg4[%c0_16, %c0_17] : memref<1x64xf32, #tpu.memory_space<vmem>>, vector<1x64xf32>
    %21 = vector.broadcast %20 : vector<1x64xf32> to vector<8x64xf32>
    %22 = arith.addf %19, %21 : vector<8x64xf32>
    %cst_18 = arith.constant 0.00999999977 : f32
    %23 = vector.broadcast %cst_18 : f32 to vector<8x64xf32>
    %24 = arith.mulf %22, %23 : vector<8x64xf32>
    %25 = arith.maximumf %22, %24 : vector<8x64xf32>
    %c0_19 = arith.constant 0 : index
    %c96 = arith.constant 96 : index
    %26 = vector.load %arg5[%c0_19, %c96] : memref<8x160xf32, #tpu.memory_space<vmem>>, vector<8x64xf32>
    tpu.vector_store %arg5[%c0_19, %c96], %25 {strides = array<i32>} : memref<8x160xf32, #tpu.memory_space<vmem>>, vector<8x64xf32>,
    return
  }
  func.func @transform_0(%arg0: i32) -> (i32, i32) {
    %c0_i32 = arith.constant 0 : i32
    %c0_i32_0 = arith.constant 0 : i32
    return %arg0, %c0_i32 : i32, i32
  }
  func.func @transform_1(%arg0: i32) -> (i32, i32) {
    %c0_i32 = arith.constant 0 : i32
    %c0_i32_0 = arith.constant 0 : i32
    %c0_i32_1 = arith.constant 0 : i32
    return %c0_i32, %c0_i32_0 : i32, i32
  }
  func.func @transform_2(%arg0: i32) -> (i32, i32) {
    %c0_i32 = arith.constant 0 : i32
    %c0_i32_0 = arith.constant 0 : i32
    %c0_i32_1 = arith.constant 0 : i32
    return %c0_i32, %c0_i32_0 : i32, i32
  }
  func.func @transform_3(%arg0: i32) -> (i32, i32) {
    %c0_i32 = arith.constant 0 : i32
    %c0_i32_0 = arith.constant 0 : i32
    %c0_i32_1 = arith.constant 0 : i32
    return %c0_i32, %c0_i32_0 : i32, i32
  }
  func.func @transform_4(%arg0: i32) -> (i32, i32) {
    %c0_i32 = arith.constant 0 : i32
    %c0_i32_0 = arith.constant 0 : i32
    return %arg0, %c0_i32 : i32, i32
  }
}

</mosaic_0001>

<bundles_post_ra>
// kernel: tpu_custom_call.1
= control target key start
LH: loop header
LB: loop body
LE: loop exit
PB: predicated region body
PF: predicated region fallthrough
CT: control target
= control target key end

     0   :  { %vm157_vm0 = vcmask 1042432   ;;  %vm22_vm1 = vcmask 429056   ;;  %vm24_vm2 = vcmask 437672   ;;  %v1030_v28 = vmov 1065369472   ;;  %s1324_s0 = inlined_call_operand.vmem [shape: f32[8,53], index: 0, kind: input, shape index: {}]   ;;  %s1325_s1 = inlined_call_operand.vmem [shape: bf16[54,736], index: 1, kind: input, shape index: {}]   ;;  %s1326_s2 = inlined_call_operand.vmem [shape: bf16[640,64], index: 2, kind: input, shape index: {}]   ;;  %s1327_s3 = inlined_call_operand.vmem [shape: f32[1,64], index: 3, kind: input, shape index: {}]   ;;  %s1328_s4 = inlined_call_operand.hbm [shape: f32[8,160], index: 4, kind: output, shape index: {}]  }
   0x1   :  { %v45_v0 = vld [vmem:[%s1325_s1 + $0x90] sm:$0x77]  ;;  %v46_v1 = vld [vmem:[%s1325_s1 + $0x98] sm:$0x77]  ;;  %v20_v5 = vld [vmem:[%s1324_s0] sm:$0xff]  ;;  %vm153_vm3 = vcmask 441344  }
   0x2   :  { %v105_v2 = vunpack.c.l.b16 %v45_v0  ;;  %v106_v3 = vunpack.c.h.b16 %v45_v0  ;;  %v107_v4 = vunpack.c.l.b16 %v46_v1  ;;  %v754_v6 = vld [vmem:[%s1325_s1 + $0x60] sm:$0xf]  ;;  %v957_v10 = vld [vmem:[%s1325_s1 + $0x74] sm:$0xf0]  ;;  %v954_v11 = vld [vmem:[%s1325_s1 + $0x64] sm:$0xf]  ;;  %v21_v15 = vpack.c.bf16 %v20_v5, %v20_v5 }
   0x3   :  { %v756_v12 = vld [vmem:[%s1325_s1 + $0x78] sm:$0xf0]  ;;  %v762_v13 = vld [vmem:[%s1325_s1 + $0x68] sm:$0xf]  ;;  %v958_v14 = vld [vmem:[%s1325_s1 + $0x7c] sm:$0xf0]  ;;  %v755_v19 = vor.u32 %v957_v10, %v754_v6  ;;  %v108_v29 = vunpack.c.h.b16 %v46_v1 }
   0x4   :  { %v129_v7 = vpack.c.b16 %v105_v2, %v105_v2  ;;  %v130_v8 = vpack.c.b16 %v106_v3, %v106_v3  ;;  %v131_v9 = vpack.c.b16 %v107_v4, %v107_v4  ;;  %v759_v20 = vor.u32 %v954_v11, %v756_v12  ;;  %v730_v21 = vld [vmem:[%s1325_s1 + $0x30] sm:$0xf]  ;;  %v951_v22 = vld [vmem:[%s1325_s1 + $0x44] sm:$0xf0]  ;;  %v948_v23 = vld [vmem:[%s1325_s1 + $0x34] sm:$0xf] }
   0x5   :  { %v763_v24 = vor.u32 %v958_v14, %v762_v13  ;;  %v732_v25 = vld [vmem:[%s1325_s1 + $0x48] sm:$0xf0]  ;;  %v738_v26 = vld [vmem:[%s1325_s1 + $0x38] sm:$0xf]  ;;  %v952_v27 = vld [vmem:[%s1325_s1 + $0x4c] sm:$0xf0]  ;;  %v731_v31 = vor.u32 %v951_v22, %v730_v21  ;;  %v132_v43 = vpack.c.b16 %v108_v29, %v108_v29 }
   0x6   :  { %v159_v16 = vsel %vm157_vm0, %v129_v7, 0  ;;  %v162_v17 = vsel %vm157_vm0, %v130_v8, 0  ;;  %v165_v18 = vsel %vm157_vm0, %v131_v9, 0  ;;  %23 = vst.msk [vmem:[#allocation2] sm:$0xf] %vm22_vm1, %v21_v15  ;;  %v735_v32 = vor.u32 %v948_v23, %v732_v25  ;;  %v967_v44 = vld [vmem:[%s1326_s2 + $0x38] sm:$0xff] }
   0x7   :  { %180 = vmatpush.bf16.msra.mxu0 %v159_v16  ;;  %193 = vmatpush.bf16.msra.mxu1 %v162_v17  ;;  %25 = vst.msk [vmem:[#allocation2] sm:$0xf] %vm24_vm2, %v1030_v28  ;;  %v47_v30 = vld [vmem:[%s1325_s1 + $0xa0] sm:$0x77]  ;;  %v739_v35 = vor.u32 %v952_v27, %v738_v26  ;;  %v945_v36 = vld [vmem:[%s1325_s1 + $0x14] sm:$0xf0] }
   0x8   :  { %206 = vmatpush.bf16.msra.mxu3 %v165_v18  ;;  %v706_v33 = vld [vmem:[%s1325_s1] sm:$0xf]  ;;  %v109_v34 = vunpack.c.l.b16 %v47_v30  ;;  %v942_v37 = vld [vmem:[%s1325_s1 + $0x4] sm:$0xf]  ;;  %v708_v38 = vld [vmem:[%s1325_s1 + $0x18] sm:$0xf0]  ;;  %v110_v39 = vunpack.c.h.b16 %v47_v30  ;;  %613 = vmatpush.bf16.msra.mxu2 %v967_v44 }
   0x9   :  { %v714_v40 = vld [vmem:[%s1325_s1 + $0x8] sm:$0xf]  ;;  %v946_v41 = vld [vmem:[%s1325_s1 + $0x1c] sm:$0xf0]  ;;  %v707_v45 = vor.u32 %v945_v36, %v706_v33  ;;  %v711_v46 = vor.u32 %v942_v37, %v708_v38  ;;  %v770_v50 = vld [vmem:[%s1325_s1 + $0x70] sm:$0xf] }
   0xa   :  { %v133_v42 = vpack.c.b16 %v109_v34, %v109_v34  ;;  %v715_v47 = vor.u32 %v946_v41, %v714_v40  ;;  %v134_v48 = vpack.c.b16 %v110_v39, %v110_v39  ;;  %v959_v51 = vld [vmem:[%s1325_s1 + $0x84] sm:$0xf0]  ;;  %v966_v52 = vld [vmem:[%s1326_s2 + $0x30] sm:$0xff]  ;;  %v168_v53 = vsel %vm157_vm0, %v132_v43, 0  ;;  %v955_v54 = vld [vmem:[%s1325_s1 + $0x6c] sm:$0xf] }
   0xb   :  { %181 = vmatpush.bf16.msra.mxu0 %v755_v19  ;;  %194 = vmatpush.bf16.msra.mxu1 %v759_v20  ;;  %v764_v55 = vld [vmem:[%s1325_s1 + $0x80] sm:$0xf0]  ;;  %v746_v57 = vld [vmem:[%s1325_s1 + $0x40] sm:$0xf]  ;;  %v953_v58 = vld [vmem:[%s1325_s1 + $0x54] sm:$0xf0]  ;;  %v771_v59 = vor.u32 %v959_v51, %v770_v50 }
   0xc   :  { %207 = vmatpush.bf16.msra.mxu3 %v763_v24  ;;  %v171_v49 = vsel %vm157_vm0, %v133_v42, 0  ;;  %v174_v60 = vsel %vm157_vm0, %v134_v48, 0  ;;  %v956_v61 = vld [vmem:[%s1325_s1 + $0x74] sm:$0xf]  ;;  %v772_v62 = vld [vmem:[%s1325_s1 + $0x88] sm:$0xf0]  ;;  %v767_v63 = vor.u32 %v955_v54, %v764_v55  ;;  %614 = vmatpush.bf16.msra.mxu2 %v966_v52 }
   0xd   :  { %v965_v0 = vld [vmem:[%s1326_s2 + $0x28] sm:$0xff] }
   0xe   :  { %v1147_v56 = vld [vmem:[#allocation2] sm:$0xf] }
   0xf   :  { %182 = vmatpush.bf16.msra.mxu0 %v731_v31  ;;  %195 = vmatpush.bf16.msra.mxu1 %v735_v32 }
  0x10   :  { %208 = vmatpush.bf16.msra.mxu3 %v739_v35 }
  0x13   :  { %183 = vmatpush.bf16.msra.mxu0 %v707_v45  ;;  %196 = vmatpush.bf16.msra.mxu1 %v711_v46 }
  0x14   :  { %209 = vmatpush.bf16.msra.mxu3 %v715_v47 }
  0x17   :  { %232 = vmatpush.bf16.msrb.mxu0 %v171_v49 }
  0x18   :  { %219 = vmatpush.bf16.msrb.mxu3 %v168_v53 }
  0x19   :  { %9 = vsyncpa [#allocation4], 0  ;;  %776 = vmatmul.msk.bf16.vlgmr.msra.gmra.mxu0 %vm153_vm3, %v1147_v56  ;;  %777 = vmatmul.msk.bf16.vlgmr.msra.gmra.mxu1 %vm153_vm3, %v1147_v56  ;;  %v949_v1 = vld [vmem:[%s1325_s1 + $0x3c] sm:$0xf]  ;;  %v740_v2 = vld [vmem:[%s1325_s1 + $0x50] sm:$0xf0]  ;;  %v775_v3 = vor.u32 %v956_v61, %v772_v62  ;;  %v747_v4 = vor.u32 %v953_v58, %v746_v57 }
  0x1a   :  { %778 = vmatmul.msk.bf16.vlgmr.msra.gmra.mxu3 %vm153_vm3, %v1147_v56  ;;  %245 = vmatpush.bf16.msrb.mxu1 %v174_v60  ;;  %v950_v5 = vld [vmem:[%s1325_s1 + $0x44] sm:$0xf]  ;;  %v748_v6 = vld [vmem:[%s1325_s1 + $0x58] sm:$0xf0]  ;;  %v743_v7 = vor.u32 %v949_v1, %v740_v2  ;;  %v722_v8 = vld [vmem:[%s1325_s1 + $0x10] sm:$0xf] }
  0x1b   :  { %233 = vmatpush.bf16.msrb.mxu0 %v771_v59  ;;  %v947_v9 = vld [vmem:[%s1325_s1 + $0x24] sm:$0xf0]  ;;  %615 = vmatpush.bf16.msra.mxu2 %v965_v0  ;;  %v964_v10 = vld [vmem:[%s1326_s2 + $0x20] sm:$0xff]  ;;  %v943_v11 = vld [vmem:[%s1325_s1 + $0xc] sm:$0xf]  ;;  %v751_v13 = vor.u32 %v950_v5, %v748_v6  ;;  %vm256_vm4 = vcmask 785408  }
  0x1c   :  { %220 = vmatpush.bf16.msrb.mxu3 %v767_v63  ;;  %v716_v12 = vld [vmem:[%s1325_s1 + $0x20] sm:$0xf0]  ;;  %v723_v14 = vor.u32 %v947_v9, %v722_v8  ;;  %v963_v16 = vld [vmem:[%s1326_s2 + $0x18] sm:$0xff]  ;;  %v962_v18 = vld [vmem:[%s1326_s2 + $0x10] sm:$0xff]  ;;  %s1031_s12 = smov 96   ;;  %s1032_s13 = smov [#allocation3]  }
  0x1d   :  { %v719_v15 = vor.u32 %v943_v11, %v716_v12  ;;  %v975_v17 = vld [vmem:[%s1326_s2 + $0x78] sm:$0xff]  ;;  %v974_v19 = vld [vmem:[%s1326_s2 + $0x70] sm:$0xff]  ;;  %v961_v20 = vld [vmem:[%s1326_s2 + $0x8] sm:$0xff]  ;;  %s693_s14 = sshll.u32 %s1032_s13, 4  ;;  %s695_s16 = sshll.u32 %s1328_s4, 4  ;;  %vm684_vm5 = vcmask 1048320   ;;  %s694_s14 = int_to_ptr.vmem [resolvable:$true] %s693_s14  ;;  %s696_s16 = int_to_ptr.hbm [resolvable:$true] %s695_s16 }
  0x1e   :  { %246 = vmatpush.bf16.msrb.mxu1 %v775_v3  ;;  %v973_v21 = vld [vmem:[%s1326_s2 + $0x68] sm:$0xff]  ;;  %v960_v22 = vld [vmem:[%s1326_s2] sm:$0xff]  ;;  %v999_v24 = vld [vmem:[%s1326_s2 + $0x138] sm:$0xff]  ;;  %vm686_vm6 = vcmask 261120  }
  0x1f   :  { %234 = vmatpush.bf16.msrb.mxu0 %v747_v4  ;;  %616 = vmatpush.bf16.msra.mxu2 %v964_v10  ;;  %v972_v23 = vld [vmem:[%s1326_s2 + $0x60] sm:$0xff]  ;;  %v971_v25 = vld [vmem:[%s1326_s2 + $0x58] sm:$0xff]  ;;  %v970_v26 = vld [vmem:[%s1326_s2 + $0x50] sm:$0xff] }
  0x20   :  { %221 = vmatpush.bf16.msrb.mxu3 %v743_v7  ;;  %v998_v27 = vld [vmem:[%s1326_s2 + $0x130] sm:$0xff]  ;;  %v724_v29 = vld [vmem:[%s1325_s1 + $0x28] sm:$0xf0]  ;;  %v983_v31 = vld [vmem:[%s1326_s2 + $0xb8] sm:$0xff] }
  0x21   :  { %v944_v28 = vld [vmem:[%s1325_s1 + $0x14] sm:$0xf]  ;;  %v991_v32 = vld [vmem:[%s1326_s2 + $0xf8] sm:$0xff]  ;;  %v969_v33 = vld [vmem:[%s1326_s2 + $0x48] sm:$0xff] }
  0x22   :  { %247 = vmatpush.bf16.msrb.mxu1 %v751_v13  ;;  %v727_v30 = vor.u32 %v944_v28, %v724_v29  ;;  %v997_v34 = vld [vmem:[%s1326_s2 + $0x128] sm:$0xff]  ;;  %v982_v35 = vld [vmem:[%s1326_s2 + $0xb0] sm:$0xff]  ;;  %v968_v37 = vld [vmem:[%s1326_s2 + $0x40] sm:$0xff] }
  0x23   :  { %235 = vmatpush.bf16.msrb.mxu0 %v723_v14  ;;  %617 = vmatpush.bf16.msra.mxu2 %v963_v16  ;;  %v990_v36 = vld [vmem:[%s1326_s2 + $0xf0] sm:$0xff]  ;;  %v996_v38 = vld [vmem:[%s1326_s2 + $0x120] sm:$0xff]  ;;  %v981_v39 = vld [vmem:[%s1326_s2 + $0xa8] sm:$0xff] }
  0x24   :  { %222 = vmatpush.bf16.msrb.mxu3 %v719_v15  ;;  %v989_v40 = vld [vmem:[%s1326_s2 + $0xe8] sm:$0xff]  ;;  %v995_v41 = vld [vmem:[%s1326_s2 + $0x118] sm:$0xff]  ;;  %v980_v42 = vld [vmem:[%s1326_s2 + $0xa0] sm:$0xff] }
  0x25   :  { %v988_v43 = vld [vmem:[%s1326_s2 + $0xe0] sm:$0xff]  ;;  %v994_v44 = vld [vmem:[%s1326_s2 + $0x110] sm:$0xff]  ;;  %v979_v45 = vld [vmem:[%s1326_s2 + $0x98] sm:$0xff] }
  0x26   :  { %248 = vmatpush.bf16.msrb.mxu1 %v727_v30  ;;  %v987_v46 = vld [vmem:[%s1326_s2 + $0xd8] sm:$0xff]  ;;  %v993_v47 = vld [vmem:[%s1326_s2 + $0x108] sm:$0xff]  ;;  %v978_v48 = vld [vmem:[%s1326_s2 + $0x90] sm:$0xff] }
  0x27   :  { %618 = vmatpush.bf16.msra.mxu2 %v962_v18  ;;  %639 = vmatpush.bf16.msra.mxu0 %v983_v31  ;;  %v986_v49 = vld [vmem:[%s1326_s2 + $0xd0] sm:$0xff]  ;;  %v992_v50 = vld [vmem:[%s1326_s2 + $0x100] sm:$0xff]  ;;  %v977_v51 = vld [vmem:[%s1326_s2 + $0x88] sm:$0xff] }
  0x28   :  { %626 = vmatpush.bf16.msra.mxu3 %v975_v17  ;;  %v985_v52 = vld [vmem:[%s1326_s2 + $0xc8] sm:$0xff]  ;;  %v976_v53 = vld [vmem:[%s1326_s2 + $0x80] sm:$0xff] }
  0x29   :  { %780 = vmatmul.msk.bf16.vlgmr.msrb.gmra.mxu0 %vm153_vm3, %v1147_v56  ;;  %781 = vmatmul.msk.bf16.vlgmr.msrb.gmra.mxu1 %vm153_vm3, %v1147_v56  ;;  %v984_v54 = vld [vmem:[%s1326_s2 + $0xc0] sm:$0xff] }
  0x2a   :  { %779 = vmatmul.msk.bf16.vlgmr.msrb.gmra.mxu3 %vm153_vm3, %v1147_v56  ;;  %652 = vmatpush.bf16.msra.mxu1 %v991_v32  ;;  %v1003_v30 = vld [vmem:[%s1327_s3] ss:$0 sm:$0xff] }
  0x2b   :  { %619 = vmatpush.bf16.msra.mxu2 %v961_v20  ;;  %640 = vmatpush.bf16.msra.mxu0 %v982_v35 }
  0x2c   :  { %627 = vmatpush.bf16.msra.mxu3 %v974_v19 }
  0x2e   :  { %653 = vmatpush.bf16.msra.mxu1 %v990_v36 }
  0x2f   :  { %620 = vmatpush.bf16.msra.mxu2 %v960_v22  ;;  %641 = vmatpush.bf16.msra.mxu0 %v981_v39 }
  0x30   :  { %628 = vmatpush.bf16.msra.mxu3 %v973_v21 }
  0x32   :  { %654 = vmatpush.bf16.msra.mxu1 %v989_v40 }
  0x33   :  { %665 = vmatpush.bf16.msrb.mxu2 %v999_v24  ;;  %642 = vmatpush.bf16.msra.mxu0 %v980_v42 }
  0x34   :  { %629 = vmatpush.bf16.msra.mxu3 %v972_v23 }
  0x36   :  { %655 = vmatpush.bf16.msra.mxu1 %v988_v43 }
  0x37   :  { %666 = vmatpush.bf16.msrb.mxu2 %v998_v27  ;;  %643 = vmatpush.bf16.msra.mxu0 %v979_v45 }
  0x38   :  { %630 = vmatpush.bf16.msra.mxu3 %v971_v25 }
  0x3a   :  { %656 = vmatpush.bf16.msra.mxu1 %v987_v46 }
  0x3b   :  { %667 = vmatpush.bf16.msrb.mxu2 %v997_v34  ;;  %644 = vmatpush.bf16.msra.mxu0 %v978_v48 }
  0x3c   :  { %631 = vmatpush.bf16.msra.mxu3 %v970_v26 }
  0x3e   :  { %657 = vmatpush.bf16.msra.mxu1 %v986_v49 }
  0x3f   :  { %668 = vmatpush.bf16.msrb.mxu2 %v996_v38  ;;  %645 = vmatpush.bf16.msra.mxu0 %v977_v51 }
  0x40   :  { %632 = vmatpush.bf16.msra.mxu3 %v969_v33 }
  0x42   :  { %658 = vmatpush.bf16.msra.mxu1 %v985_v52 }
  0x43   :  { %669 = vmatpush.bf16.msrb.mxu2 %v995_v41  ;;  %646 = vmatpush.bf16.msra.mxu0 %v976_v53 }
  0x44   :  { %633 = vmatpush.bf16.msra.mxu3 %v968_v37 }
  0x46   :  { %659 = vmatpush.bf16.msra.mxu1 %v984_v54 }
  0x47   :  { %670 = vmatpush.bf16.msrb.mxu2 %v994_v44 }
  0x4b   :  { %671 = vmatpush.bf16.msrb.mxu2 %v993_v47 }
  0x4f   :  { %672 = vmatpush.bf16.msrb.mxu2 %v992_v50 }
  0x96   :  { %v185_v55 = vpop.f32.mrf.mxu0  ;;  %v198_v56 = vpop.f32.mrf.mxu1 }
  0x97   :  { %v258_v57 = vpack.c.bf16 %v198_v56, %v185_v55 }
  0x99   :  { %v261_v58 = vunpack.c.l.bf16 %v258_v57  ;;  %v262_v59 = vunpack.c.h.bf16 %v258_v57 }
  0x9b   :  { %v267_v60 = vmul.f32 0.010009766, %v262_v59  ;;  %v266_v61 = vmul.f32 0.010009766, %v261_v58 }
  0x9d   :  { %v280_v62 = vmax.f32 %v262_v59, %v267_v60  ;;  %v211_v63 = vpop.f32.mrf.mxu3  ;;  %v279_v0 = vmax.f32 %v261_v58, %v266_v61 }
  0x9e   :  { %v187_v1 = vpop.f32.mrf.mxu0  ;;  %v200_v2 = vpop.f32.mrf.mxu1 }
  0x9f   :  { %v285_v3 = vpack.c.bf16 %v280_v62, %v280_v62  ;;  %v284_v4 = vpack.c.bf16 %v279_v0, %v279_v0 }
  0xa1   :  { %621 = vmatmul.bf16.vlgmr.msra.gmra.mxu2 %v284_v4  ;;  %634 = vmatmul.bf16.vlgmr.msra.gmra.mxu3 %v285_v3 }
  0xa5   :  { %v213_v5 = vpop.f32.mrf.mxu3 }
  0xa6   :  { %v237_v6 = vpop.f32.mrf.mxu0  ;;  %v250_v24 = vpop.f32.mrf.mxu1 }
  0xa7   :  { %v260_v7 = vpack.c.bf16 %v237_v6, %v237_v6  ;;  %v254_v25 = vmul.f32 0.01, %v250_v24 }
  0xa9   :  { %v265_v8 = vunpack.c.l.bf16 %v260_v7  ;;  %v255_v26 = vmax.f32 %v250_v24, %v254_v25 }
  0xab   :  { %v270_v9 = vmul.f32 0.010009766, %v265_v8  ;;  %257 = vst.msk [vmem:[#allocation3] sm:$0xff] %vm256_vm4, %v255_v26 }
  0xad   :  { %v283_v10 = vmax.f32 %v265_v8, %v270_v9  ;;  %v224_v11 = vpop.f32.mrf.mxu3 }
  0xae   :  { %v259_v12 = vpack.c.bf16 %v224_v11, %v211_v63  ;;  %v239_v13 = vpop.f32.mrf.mxu0  ;;  %v252_v27 = vpop.f32.mrf.mxu1 }
  0xaf   :  { %v288_v14 = vpack.c.bf16 %v283_v10, %v283_v10 }
  0xb0   :  { %v263_v15 = vunpack.c.l.bf16 %v259_v12  ;;  %v264_v16 = vunpack.c.h.bf16 %v259_v12 }
  0xb1   :  { %673 = vmatmul.bf16.vlgmr.msrb.gmra.mxu2 %v288_v14 }
  0xb2   :  { %v268_v17 = vmul.f32 0.010009766, %v263_v15  ;;  %v269_v18 = vmul.f32 0.010009766, %v264_v16 }
  0xb4   :  { %v281_v19 = vmax.f32 %v263_v15, %v268_v17  ;;  %v282_v20 = vmax.f32 %v264_v16, %v269_v18 }
  0xb5   :  { %v226_v21 = vpop.f32.mrf.mxu3 }
  0xb6   :  { %v286_v22 = vpack.c.bf16 %v281_v19, %v281_v19  ;;  %v287_v23 = vpack.c.bf16 %v282_v20, %v282_v20 }
  0xb8   :  { %647 = vmatmul.bf16.vlgmr.msra.gmra.mxu0 %v286_v22  ;;  %660 = vmatmul.bf16.vlgmr.msra.gmra.mxu1 %v287_v23 }
 0x124   :  { %v622_v28 = vpop.f32.mrf.mxu2  ;;  %v635_v29 = vpop.f32.mrf.mxu3 }
 0x125   :  { %v623_v33 = vadd.f32 %v1003_v30, %v622_v28 }
 0x127   :  { %v636_v34 = vadd.f32 %v635_v29, %v623_v33 }
 0x12c   :  { %v624_v31 = vpop.f32.mrf.mxu2  ;;  %v637_v32 = vpop.f32.mrf.mxu3 }
 0x134   :  { %v674_v35 = vpop.f32.mrf.mxu2 }
 0x135   :  { %v648_v36 = vpop.f32.mrf.mxu0  ;;  %v661_v37 = vpop.f32.mrf.mxu1 }
 0x136   :  { %v649_v38 = vadd.f32 %v648_v36, %v636_v34 }
 0x138   :  { %v662_v39 = vadd.f32 %v661_v37, %v649_v38 }
 0x13a   :  { %v675_v40 = vadd.f32 %v674_v35, %v662_v39 }
 0x13c   :  { %v678_v41 = vmul.f32 0.01, %v675_v40  ;;  %v676_v42 = vpop.f32.mrf.mxu2 }
 0x13d   :  { %v650_v43 = vpop.f32.mrf.mxu0  ;;  %v663_v44 = vpop.f32.mrf.mxu1 }
 0x13e   :  { %v679_v45 = vmax.f32 %v675_v40, %v678_v41 }
 0x140   :  { %681 = vrot.lane.b32.xlu0 %v679_v45, %s1031_s12 }
 0x1b2   :  { %v682_v46 = vpop.permute.xlu0 %681 }
 0x1b3   :  { %685 = vst.msk [vmem:[#allocation3] sm:$0xff] %vm684_vm5, %v682_v46 }
 0x1b4   :  { %687 = vst.msk [vmem:[#allocation3 + $0x8] sm:$0xff] %vm686_vm6, %v682_v46 }
 0x1b5   :  { %698 = dma.vmem_to_hbm [thread:$0]  %s694_s14, 256, %s696_s16, [#allocation4]  }
 0x1b6   :  { %1028 = dma.done.wait [#allocation4], 256  }
 0x1b7   :  { %1029 = vsyncadd [#allocation4], 4294967040 }
 0x1b8   :  { %703 = vsyncpa [#allocation4], 1 }

</bundles_post_ra>
